<compile_context>
chip_gen: v5e
topology: v5e:2x2
jax: 0.10.0
libtpu: 0.0.40
codegen_flags: <defaults>
</compile_context>

<pallas_src>
import functools

import jax
import jax.numpy as jnp
import numpy as np
from jax import lax
from jax.experimental import pallas as pl
from jax.experimental.pallas import tpu as pltpu

NEG_SLOPE = 0.01                       # torch.nn.functional.leaky_relu default
STREAM_DTYPE = jnp.bfloat16            # causal stream + packed causal weights
VMEM_TILE_BUDGET = 24 * 1024 * 1024    # per-grid-step working-set target
MIN_GRID_STEPS = 4                     # keep >= 4 steps for v7x megacore


def _leaky(x):
    return jnp.where(x >= 0, x, NEG_SLOPE * x)


def _round_up(x, m):
    return ((x + m - 1) // m) * m


# ---------------------------------------------------------------------------
# Tap geometry.
# The image is embedded in a zero-guarded "causal stream": reach*(W+1) leading
# zeros, then the H*W pixels row-major.  Tap k of output pixel m then lives at
# stream offset m + o_k, and is valid only if its column offset d_k keeps
# col(m) + d_k inside [0, W).
# ---------------------------------------------------------------------------
def _tap_offsets(reach, W):
    offsets, dcols = [], []
    for a in range(reach):                      # conv00T: rows i-reach .. i-1
        for b in range(2 * reach + 1):          #          cols j-reach .. j+reach
            offsets.append(a * W + b)
            dcols.append(b - reach)
    for b in range(reach):                      # conv00L: row i, cols j-reach .. j-1
        offsets.append(reach * W + b)
        dcols.append(b - reach)
    return offsets, dcols


# ---------------------------------------------------------------------------
# Tile selection: biggest lane-aligned row tile under a VMEM budget, while
# keeping enough grid steps for megacore sharding.
# ---------------------------------------------------------------------------
def _bytes_per_pixel(reach, nch, stream_bytes):
    K = reach * (2 * reach + 1) + reach
    cmax = max(nch)
    return (2 * stream_bytes            # input tile, double buffered
            + 2 * 4                     # (1, TM) i32 column index, double buffered
            + 2 * stream_bytes * K      # tap matrix + masked copy
            + 2 * 4 * cmax              # two live f32 activation tiles
            + 2 * 4 * nch[-1])          # output tile, double buffered


def _select_tile(H, W, reach, nbatch, bpp,
                 budget=VMEM_TILE_BUDGET, min_steps=MIN_GRID_STEPS):
    """Returns (TM, Mp): pixels per grid step and the padded pixel count."""
    M = H * W
    need = reach * W + reach                    # halo elements a tile reaches
    cands = [tr * W for tr in range(1, H + 1)
             if H % tr == 0 and (tr * W) % 128 == 0 and tr * W >= need]
    if not cands:
        # No lane-aligned row tiling: one 128-aligned tile per image; the
        # padded outputs are sliced off in the wrapper (keeps stores lane dense).
        tm = _round_up(max(M, need), 128)
        return tm, tm
    budget_px = max(128, budget // bpp)
    steps_per_image = max(1, -(-min_steps // nbatch))          # ceil
    cap_px = max(128, M // steps_per_image)
    fits = [tm for tm in cands if tm <= min(budget_px, cap_px)]
    tm = max(fits) if fits else min(cands)
    return tm, M


def _pick_halo_block(tile_px, need):
    for cand in range(128, tile_px + 1, 128):
        if tile_px % cand == 0 and cand >= need:
            return cand
    return tile_px


def _flatten_causal(img, reach, length, dtype):
    # (N, H, W) -> (N, 1, length) zero-guarded causal stream with a single pad
    # (one HBM copy).  Image data starts at offset reach*(W+1).
    N, H, W = img.shape
    front = reach * (W + 1)
    flat = img.reshape(N, H * W).astype(dtype)
    flat = jnp.pad(flat, ((0, 0), (front, length - front - H * W)))
    return flat.reshape(N, 1, length)


# ---------------------------------------------------------------------------
# Pallas kernel: in-VMEM tap build + causal conv as matmul + 1x1 conv stack.
# Everything is in (channels, pixels) layout so the output store is lane dense.
# ---------------------------------------------------------------------------
def _make_kernel(offsets, n_layers, tile_px, width, last_is_vpu_sum):
    def kernel(*refs):
        cur_ref, halo_ref, col_ref, dcol_ref, w0_ref, b0_ref = refs[:6]
        layer_refs = refs[6:6 + 2 * n_layers]
        out_ref = refs[6 + 2 * n_layers]

        # Causal context window for this tile: [tile | halo] of the stream.
        win = jnp.concatenate([cur_ref[...], halo_ref[...]], axis=1)

        # (K, TM) tap matrix from static shifted slices of the stream.
        patch = jnp.concatenate([win[:, o:o + tile_px] for o in offsets], axis=0)

        # Left/right border mask, rebuilt in-kernel (no TM-scaled HBM input):
        # tap k of a pixel in image column c is valid iff 0 <= c + d_k < W.
        cpd = col_ref[...] + dcol_ref[...]            # (1,TM) + (K,1) -> (K,TM)
        mask = (cpd >= 0) & (cpd < width)
        patch = jnp.where(mask, patch, jnp.zeros_like(patch))

        # conv00T + conv00L as one MXU matmul (bf16 x bf16 -> f32 accumulate).
        h = jnp.dot(w0_ref[...], patch, preferred_element_type=jnp.float32)
        h = _leaky(h + b0_ref[...])

        # 1x1 conv stack (f32, (C, px) layout).
        for kl in range(n_layers):
            w = layer_refs[2 * kl][...]
            b = layer_refs[2 * kl + 1][...]
            if kl == n_layers - 1 and last_is_vpu_sum:
                # Single output channel: VPU weighted sum + sublane reduce
                # instead of a 1-useful-row MXU matmul.
                h = jnp.sum(w * h, axis=0, keepdims=True) + b
            else:
                h = jnp.dot(w, h, preferred_element_type=jnp.float32) + b
            h = _leaky(h) if kl < n_layers - 1 else jnp.clip(h, -1.0, 1.0)

        out_ref[...] = h.astype(out_ref.dtype)        # (c_last, TM), lane dense

    return kernel


# ---------------------------------------------------------------------------
# Parameter handling (deterministic synthetic init, PyTorch-native shapes).
# ---------------------------------------------------------------------------
def init_params(key, reach, nch):
    keys = jax.random.split(key, 3 + 2 * (len(nch) - 1))
    wT = 0.2 * jax.random.normal(keys[0], (nch[0], 1, reach, 2 * reach + 1),
                                 jnp.float32)
    bT = 0.1 * jax.random.normal(keys[1], (nch[0],), jnp.float32)
    wL = 0.2 * jax.random.normal(keys[2], (nch[0], 1, 1, reach), jnp.float32)
    layers = []
    for kl in range(len(nch) - 1):
        w = 0.3 * jax.random.normal(keys[3 + 2 * kl],
                                    (nch[kl + 1], nch[kl], 1, 1), jnp.float32)
        b = 0.1 * jax.random.normal(keys[4 + 2 * kl], (nch[kl + 1],),
                                    jnp.float32)
        layers.append((w, b))
    return dict(wT=wT, bT=bT, wL=wL, layers=layers)


def _pack_params(params, reach, nch):
    c0 = nch[0]
    wT = params["wT"].reshape(c0, reach * (2 * reach + 1))      # (c0, Kt)
    wL = params["wL"].reshape(c0, reach)                        # (c0, reach)
    w0 = jnp.concatenate([wT, wL], axis=1)                      # (c0, K)
    b0 = params["bT"].reshape(c0, 1)
    layer_mats = [(w[:, :, 0, 0], b.reshape(-1, 1))             # (Cout,Cin),(Cout,1)
                  for (w, b) in params["layers"]]
    return w0, b0, layer_mats


def _resident_spec(arr):
    zeros = (0,) * arr.ndim
    return pl.BlockSpec(arr.shape, lambda n, t: zeros)          # VMEM-resident


# ---------------------------------------------------------------------------
# Wrapper: pallas_call over a (batch, pixel-tile) grid.
# ---------------------------------------------------------------------------
@functools.partial(jax.jit, static_argnums=(2, 3))
def causal_conv_pallas(x, params, reach, nch):
    N, cin, H, W = x.shape
    assert cin == 1, "CausalConv takes single-channel input"
    M = H * W
    c_last = nch[-1]
    stream_bytes = jnp.dtype(STREAM_DTYPE).itemsize
    bpp = _bytes_per_pixel(reach, nch, stream_bytes)

    TM, Mp = _select_tile(H, W, reach, N, bpp)       # pixels per grid step
    need = reach * W + reach                         # halo a tile reaches into
    if TM < need:
        raise ValueError("image too small for this reach")
    HALO = _pick_halo_block(TM, need)
    T = Mp // TM
    Lp = (T + 1) * TM                                # padded stream length

    xflat = _flatten_causal(x[:, 0], reach, Lp, STREAM_DTYPE)   # (N, 1, Lp)

    offsets, dcols = _tap_offsets(reach, W)
    # TM % W == 0 on the tiled path (and T == 1 on the fallback path), so the
    # within-tile column index is tile-independent -> tiny resident constant.
    col = jnp.asarray((np.arange(TM) % W).astype(np.int32).reshape(1, TM))
    dvec = jnp.asarray(np.asarray(dcols, np.int32).reshape(-1, 1))

    w0, b0, layer_mats = _pack_params(params, reach, nch)
    w0 = w0.astype(STREAM_DTYPE)                     # bf16 MXU path
    n_layers = len(layer_mats)
    last_is_vpu_sum = (c_last == 1)

    layer_inputs = []
    for kl, (w, b) in enumerate(layer_mats):
        if last_is_vpu_sum and kl == n_layers - 1:
            w = w.T                                  # (1, cin) -> (cin, 1)
        layer_inputs += [w, b]

    const_inputs = [col, dvec, w0, b0] + layer_inputs
    in_specs = [
        # current pixel tile of the causal stream
        pl.BlockSpec((None, 1, TM), lambda n, t: (n, 0, t)),
        # small halo block right after the tile (covers taps that spill over)
        pl.BlockSpec((None, 1, HALO),
                     lambda n, t: (n, 0, (t + 1) * (TM // HALO))),
    ] + [_resident_spec(a) for a in const_inputs]

    # Raise the scoped-VMEM limit for large tiles (v5e default is only 16 MiB),
    # but stay well under v7x's 64 MiB physical VMEM.
    vmem_limit = int(min(48 * 1024 * 1024,
                         max(32 * 1024 * 1024, 3 * bpp * TM)))

    out = pl.pallas_call(
        _make_kernel(tuple(offsets), n_layers, TM, W, last_is_vpu_sum),
        out_shape=jax.ShapeDtypeStruct((N, c_last, Mp), jnp.float32),
        grid=(N, T),
        in_specs=in_specs,
        out_specs=pl.BlockSpec((None, c_last, TM), lambda n, t: (n, 0, t)),
        compiler_params=pltpu.CompilerParams(
            dimension_semantics=("parallel", "parallel"),
            vmem_limit_bytes=vmem_limit),
    )(xflat, xflat, *const_inputs)

    # (N, c_last, H*W) -> NCHW is a free reshape (no transpose pass).
    return out[:, :, :M].reshape(N, c_last, H, W)


# ---------------------------------------------------------------------------
# Pure-JAX reference mirroring the PyTorch forward exactly (for verification).
# ---------------------------------------------------------------------------
def reference_forward(x, params, reach):
    dn = ("NCHW", "OIHW", "NCHW")
    xt_in = jnp.pad(x[:, :, :-1, :],
                    ((0, 0), (0, 0), (reach, 0), (reach, reach)))
    xt = lax.conv_general_dilated(xt_in, params["wT"], (1, 1), "VALID",
                                  dimension_numbers=dn)
    xt = xt + params["bT"][None, :, None, None]
    xl_in = jnp.pad(x[:, :, :, :-1], ((0, 0), (0, 0), (0, 0), (reach, 0)))
    xl = lax.conv_general_dilated(xl_in, params["wL"], (1, 1), "VALID",
                                  dimension_numbers=dn)
    h = _leaky(xt + xl)
    n_layers = len(params["layers"])
    for kl, (w, b) in enumerate(params["layers"]):
        h = lax.conv_general_dilated(h, w, (1, 1), "VALID",
                                     dimension_numbers=dn)
        h = h + b[None, :, None, None]
        h = _leaky(h) if kl < n_layers - 1 else jnp.clip(h, -1.0, 1.0)
    return h


if __name__ == "__main__":
    reach = 2
    nch = (8, 16, 8, 1)
    N, H, W = 2, 16, 16

    key = jax.random.PRNGKey(0)
    kx, kp = jax.random.split(key)
    x = jax.random.normal(kx, (N, 1, H, W), jnp.float32)
    params = init_params(kp, reach, nch)

    out = jax.block_until_ready(causal_conv_pallas(x, params, reach, nch))

    ref = reference_forward(x, params, reach)
    assert out.shape == ref.shape, (out.shape, ref.shape)
    # bf16 stream / first-layer weights (f32 accumulation) -> loosened tolerance.
    if not np.allclose(np.asarray(out), np.asarray(ref), atol=2e-2, rtol=2e-2):
        max_err = float(jnp.max(jnp.abs(out - ref)))
        raise AssertionError(f"Pallas vs reference mismatch, max abs err={max_err}")

    print("KERNEL_OK")
</pallas_src>

<mosaic_0001>
module attributes {stable_mosaic.version = 11 : i64} {
  func.func @kernel(%arg0: i32, %arg1: i32, %arg2: memref<1x1x128xbf16, #tpu.memory_space<vmem>>, %arg3: memref<1x1x128xbf16, #tpu.memory_space<vmem>>, %arg4: memref<1x128xi32, #tpu.memory_space<vmem>>, %arg5: memref<12x1xi32, #tpu.memory_space<vmem>>, %arg6: memref<8x12xbf16, #tpu.memory_space<vmem>>, %arg7: memref<8x1xf32, #tpu.memory_space<vmem>>, %arg8: memref<16x8xf32, #tpu.memory_space<vmem>>, %arg9: memref<16x1xf32, #tpu.memory_space<vmem>>, %arg10: memref<8x16xf32, #tpu.memory_space<vmem>>, %arg11: memref<8x1xf32, #tpu.memory_space<vmem>>, %arg12: memref<8x1xf32, #tpu.memory_space<vmem>>, %arg13: memref<1x1xf32, #tpu.memory_space<vmem>>, %arg14: memref<1x1x128xf32, #tpu.memory_space<vmem>>) attributes {dimension_semantics = [#tpu.dimension_semantics<parallel>, #tpu.dimension_semantics<parallel>], iteration_bounds = array<i64: 2, 2>, scalar_prefetch = 0 : i64, scratch_operands = 0 : i64, tpu.core_type = #tpu.core_type<tc>, window_params = [{transform_indices = @transform_0, window_bounds = array<i64: 1, 1, 128>}, {transform_indices = @transform_1, window_bounds = array<i64: 1, 1, 128>}, {pipeline_mode = #tpu.pipeline_mode<synchronous>, transform_indices = @transform_2, window_bounds = array<i64: 1, 128>}, {pipeline_mode = #tpu.pipeline_mode<synchronous>, transform_indices = @transform_3, window_bounds = array<i64: 12, 1>}, {pipeline_mode = #tpu.pipeline_mode<synchronous>, transform_indices = @transform_4, window_bounds = array<i64: 8, 12>}, {pipeline_mode = #tpu.pipeline_mode<synchronous>, transform_indices = @transform_5, window_bounds = array<i64: 8, 1>}, {pipeline_mode = #tpu.pipeline_mode<synchronous>, transform_indices = @transform_6, window_bounds = array<i64: 16, 8>}, {pipeline_mode = #tpu.pipeline_mode<synchronous>, transform_indices = @transform_7, window_bounds = array<i64: 16, 1>}, {pipeline_mode = #tpu.pipeline_mode<synchronous>, transform_indices = @transform_8, window_bounds = array<i64: 8, 16>}, {pipeline_mode = #tpu.pipeline_mode<synchronous>, transform_indices = @transform_9, window_bounds = array<i64: 8, 1>}, {pipeline_mode = #tpu.pipeline_mode<synchronous>, transform_indices = @transform_10, window_bounds = array<i64: 8, 1>}, {pipeline_mode = #tpu.pipeline_mode<synchronous>, transform_indices = @transform_11, window_bounds = array<i64: 1, 1>}, {transform_indices = @transform_12, window_bounds = array<i64: 1, 1, 128>}]} {
    %c0 = arith.constant 0 : index
    %c0_0 = arith.constant 0 : index
    %c0_1 = arith.constant 0 : index
    %0 = vector.load %arg2[%c0, %c0_0, %c0_1] : memref<1x1x128xbf16, #tpu.memory_space<vmem>>, vector<1x1x128xbf16>
    %1 = vector.shape_cast %0 : vector<1x1x128xbf16> to vector<1x128xbf16>
    %c0_2 = arith.constant 0 : index
    %c0_3 = arith.constant 0 : index
    %c0_4 = arith.constant 0 : index
    %2 = vector.load %arg3[%c0_2, %c0_3, %c0_4] : memref<1x1x128xbf16, #tpu.memory_space<vmem>>, vector<1x1x128xbf16>
    %3 = vector.shape_cast %2 : vector<1x1x128xbf16> to vector<1x128xbf16>
    %4 = tpu.concatenate %1, %3 in 1 : vector<1x128xbf16>, vector<1x128xbf16> -> vector<1x256xbf16>
    %5 = vector.extract_strided_slice %4 {offsets = [0, 0], sizes = [1, 128], strides = [1, 1]} : vector<1x256xbf16> to vector<1x128xbf16>
    %6 = vector.extract_strided_slice %4 {offsets = [0, 1], sizes = [1, 128], strides = [1, 1]} : vector<1x256xbf16> to vector<1x128xbf16>
    %7 = vector.extract_strided_slice %4 {offsets = [0, 2], sizes = [1, 128], strides = [1, 1]} : vector<1x256xbf16> to vector<1x128xbf16>
    %8 = vector.extract_strided_slice %4 {offsets = [0, 3], sizes = [1, 128], strides = [1, 1]} : vector<1x256xbf16> to vector<1x128xbf16>
    %9 = vector.extract_strided_slice %4 {offsets = [0, 4], sizes = [1, 128], strides = [1, 1]} : vector<1x256xbf16> to vector<1x128xbf16>
    %10 = vector.extract_strided_slice %4 {offsets = [0, 16], sizes = [1, 128], strides = [1, 1]} : vector<1x256xbf16> to vector<1x128xbf16>
    %11 = vector.extract_strided_slice %4 {offsets = [0, 17], sizes = [1, 128], strides = [1, 1]} : vector<1x256xbf16> to vector<1x128xbf16>
    %12 = vector.extract_strided_slice %4 {offsets = [0, 18], sizes = [1, 128], strides = [1, 1]} : vector<1x256xbf16> to vector<1x128xbf16>
    %13 = vector.extract_strided_slice %4 {offsets = [0, 19], sizes = [1, 128], strides = [1, 1]} : vector<1x256xbf16> to vector<1x128xbf16>
    %14 = vector.extract_strided_slice %4 {offsets = [0, 20], sizes = [1, 128], strides = [1, 1]} : vector<1x256xbf16> to vector<1x128xbf16>
    %15 = vector.extract_strided_slice %4 {offsets = [0, 32], sizes = [1, 128], strides = [1, 1]} : vector<1x256xbf16> to vector<1x128xbf16>
    %16 = vector.extract_strided_slice %4 {offsets = [0, 33], sizes = [1, 128], strides = [1, 1]} : vector<1x256xbf16> to vector<1x128xbf16>
    %17 = tpu.concatenate %5, %6, %7, %8, %9, %10, %11, %12, %13, %14, %15, %16 in 0 : vector<1x128xbf16>, vector<1x128xbf16>, vector<1x128xbf16>, vector<1x128xbf16>, vector<1x128xbf16>, vector<1x128xbf16>, vector<1x128xbf16>, vector<1x128xbf16>, vector<1x128xbf16>, vector<1x128xbf16>, vector<1x128xbf16>, vector<1x128xbf16> -> vector<12x128xbf16>
    %c0_5 = arith.constant 0 : index
    %c0_6 = arith.constant 0 : index
    %18 = vector.load %arg4[%c0_5, %c0_6] : memref<1x128xi32, #tpu.memory_space<vmem>>, vector<1x128xi32>
    %c0_7 = arith.constant 0 : index
    %c0_8 = arith.constant 0 : index
    %19 = vector.load %arg5[%c0_7, %c0_8] : memref<12x1xi32, #tpu.memory_space<vmem>>, vector<12x1xi32>
    %20 = vector.broadcast %18 : vector<1x128xi32> to vector<12x128xi32>
    %21 = vector.broadcast %19 : vector<12x1xi32> to vector<12x128xi32>
    %22 = arith.addi %20, %21 : vector<12x128xi32>
    %c0_i32 = arith.constant 0 : i32
    %23 = vector.broadcast %c0_i32 : i32 to vector<12x128xi32>
    %24 = arith.cmpi sge, %22, %23 : vector<12x128xi32>
    %c16_i32 = arith.constant 16 : i32
    %25 = vector.broadcast %c16_i32 : i32 to vector<12x128xi32>
    %26 = arith.cmpi slt, %22, %25 : vector<12x128xi32>
    %27 = arith.andi %24, %26 : vector<12x128xi1>
    %cst = arith.constant 0.000000e+00 : bf16
    %28 = vector.broadcast %cst : bf16 to vector<12x128xbf16>
    %29 = arith.select %27, %17, %28 : vector<12x128xi1>, vector<12x128xbf16>
    %c0_9 = arith.constant 0 : index
    %c0_10 = arith.constant 0 : index
    %30 = vector.load %arg6[%c0_9, %c0_10] : memref<8x12xbf16, #tpu.memory_space<vmem>>, vector<8x12xbf16>
    %cst_11 = arith.constant dense<0.000000e+00> : vector<8x128xf32>
    %31 = tpu.matmul %30, %29, %cst_11 {dimension_numbers = #tpu.dot_dimension_numbers<[1], [0], [0], [1], [0, 0, 1, 1], [], []>} : vector<8x12xbf16>, vector<12x128xbf16>, vector<8x128xf32> -> vector<8x128xf32>
    %c0_12 = arith.constant 0 : index
    %c0_13 = arith.constant 0 : index
    %32 = vector.load %arg7[%c0_12, %c0_13] : memref<8x1xf32, #tpu.memory_space<vmem>>, vector<8x1xf32>
    %33 = vector.broadcast %32 : vector<8x1xf32> to vector<8x128xf32>
    %34 = arith.addf %31, %33 : vector<8x128xf32>
    %cst_14 = arith.constant 0.000000e+00 : f32
    %35 = vector.broadcast %cst_14 : f32 to vector<8x128xf32>
    %36 = arith.cmpf oge, %34, %35 : vector<8x128xf32>
    %cst_15 = arith.constant 0.00999999977 : f32
    %37 = vector.broadcast %cst_15 : f32 to vector<8x128xf32>
    %38 = arith.mulf %37, %34 : vector<8x128xf32>
    %39 = arith.select %36, %34, %38 : vector<8x128xi1>, vector<8x128xf32>
    %c0_16 = arith.constant 0 : index
    %c0_17 = arith.constant 0 : index
    %40 = vector.load %arg8[%c0_16, %c0_17] : memref<16x8xf32, #tpu.memory_space<vmem>>, vector<16x8xf32>
    %c0_18 = arith.constant 0 : index
    %c0_19 = arith.constant 0 : index
    %41 = vector.load %arg9[%c0_18, %c0_19] : memref<16x1xf32, #tpu.memory_space<vmem>>, vector<16x1xf32>
    %cst_20 = arith.constant dense<0.000000e+00> : vector<16x128xf32>
    %42 = tpu.matmul %40, %39, %cst_20 {dimension_numbers = #tpu.dot_dimension_numbers<[1], [0], [0], [1], [0, 0, 1, 1], [], []>} : vector<16x8xf32>, vector<8x128xf32>, vector<16x128xf32> -> vector<16x128xf32>
    %43 = vector.broadcast %41 : vector<16x1xf32> to vector<16x128xf32>
    %44 = arith.addf %42, %43 : vector<16x128xf32>
    %cst_21 = arith.constant 0.000000e+00 : f32
    %45 = vector.broadcast %cst_21 : f32 to vector<16x128xf32>
    %46 = arith.cmpf oge, %44, %45 : vector<16x128xf32>
    %cst_22 = arith.constant 0.00999999977 : f32
    %47 = vector.broadcast %cst_22 : f32 to vector<16x128xf32>
    %48 = arith.mulf %47, %44 : vector<16x128xf32>
    %49 = arith.select %46, %44, %48 : vector<16x128xi1>, vector<16x128xf32>
    %c0_23 = arith.constant 0 : index
    %c0_24 = arith.constant 0 : index
    %50 = vector.load %arg10[%c0_23, %c0_24] : memref<8x16xf32, #tpu.memory_space<vmem>>, vector<8x16xf32>
    %c0_25 = arith.constant 0 : index
    %c0_26 = arith.constant 0 : index
    %51 = vector.load %arg11[%c0_25, %c0_26] : memref<8x1xf32, #tpu.memory_space<vmem>>, vector<8x1xf32>
    %cst_27 = arith.constant dense<0.000000e+00> : vector<8x128xf32>
    %52 = tpu.matmul %50, %49, %cst_27 {dimension_numbers = #tpu.dot_dimension_numbers<[1], [0], [0], [1], [0, 0, 1, 1], [], []>} : vector<8x16xf32>, vector<16x128xf32>, vector<8x128xf32> -> vector<8x128xf32>
    %53 = vector.broadcast %51 : vector<8x1xf32> to vector<8x128xf32>
    %54 = arith.addf %52, %53 : vector<8x128xf32>
    %cst_28 = arith.constant 0.000000e+00 : f32
    %55 = vector.broadcast %cst_28 : f32 to vector<8x128xf32>
    %56 = arith.cmpf oge, %54, %55 : vector<8x128xf32>
    %cst_29 = arith.constant 0.00999999977 : f32
    %57 = vector.broadcast %cst_29 : f32 to vector<8x128xf32>
    %58 = arith.mulf %57, %54 : vector<8x128xf32>
    %59 = arith.select %56, %54, %58 : vector<8x128xi1>, vector<8x128xf32>
    %c0_30 = arith.constant 0 : index
    %c0_31 = arith.constant 0 : index
    %60 = vector.load %arg12[%c0_30, %c0_31] : memref<8x1xf32, #tpu.memory_space<vmem>>, vector<8x1xf32>
    %c0_32 = arith.constant 0 : index
    %c0_33 = arith.constant 0 : index
    %61 = vector.load %arg13[%c0_32, %c0_33] : memref<1x1xf32, #tpu.memory_space<vmem>>, vector<1x1xf32>
    %62 = vector.broadcast %60 : vector<8x1xf32> to vector<8x128xf32>
    %63 = arith.mulf %62, %59 : vector<8x128xf32>
    %cst_34 = arith.constant dense<0.000000e+00> : vector<128xf32>
    %64 = vector.multi_reduction <add>, %63, %cst_34 [0] : vector<8x128xf32> to vector<128xf32>
    %65 = vector.shape_cast %64 : vector<128xf32> to vector<1x128xf32>
    %66 = vector.broadcast %61 : vector<1x1xf32> to vector<1x128xf32>
    %67 = arith.addf %65, %66 : vector<1x128xf32>
    %cst_35 = arith.constant -1.000000e+00 : f32
    %cst_36 = arith.constant 1.000000e+00 : f32
    %68 = vector.broadcast %cst_35 : f32 to vector<1x128xf32>
    %69 = arith.maximumf %68, %67 : vector<1x128xf32>
    %70 = vector.broadcast %cst_36 : f32 to vector<1x128xf32>
    %71 = arith.minimumf %70, %69 : vector<1x128xf32>
    %c0_37 = arith.constant 0 : index
    %c0_38 = arith.constant 0 : index
    %c0_39 = arith.constant 0 : index
    %72 = vector.load %arg14[%c0_37, %c0_38, %c0_39] : memref<1x1x128xf32, #tpu.memory_space<vmem>>, vector<1x1x128xf32>
    %73 = vector.shape_cast %72 : vector<1x1x128xf32> to vector<1x128xf32>
    %74 = vector.shape_cast %71 : vector<1x128xf32> to vector<1x1x128xf32>
    tpu.vector_store %arg14[%c0_37, %c0_38, %c0_39], %74 {strides = array<i32>} : memref<1x1x128xf32, #tpu.memory_space<vmem>>, vector<1x1x128xf32>,
    return
  }
  func.func @transform_0(%arg0: i32, %arg1: i32) -> (i32, i32, i32) {
    %c0_i32 = arith.constant 0 : i32
    %c0_i32_0 = arith.constant 0 : i32
    return %arg0, %c0_i32, %arg1 : i32, i32, i32
  }
  func.func @transform_1(%arg0: i32, %arg1: i32) -> (i32, i32, i32) {
    %c1_i32 = arith.constant 1 : i32
    %0 = arith.addi %arg1, %c1_i32 : i32
    %c1_i32_0 = arith.constant 1 : i32
    %1 = arith.muli %0, %c1_i32_0 : i32
    %c0_i32 = arith.constant 0 : i32
    %c0_i32_1 = arith.constant 0 : i32
    return %arg0, %c0_i32, %1 : i32, i32, i32
  }
  func.func @transform_2(%arg0: i32, %arg1: i32) -> (i32, i32) {
    %c0_i32 = arith.constant 0 : i32
    %c0_i32_0 = arith.constant 0 : i32
    %c0_i32_1 = arith.constant 0 : i32
    return %c0_i32, %c0_i32_0 : i32, i32
  }
  func.func @transform_3(%arg0: i32, %arg1: i32) -> (i32, i32) {
    %c0_i32 = arith.constant 0 : i32
    %c0_i32_0 = arith.constant 0 : i32
    %c0_i32_1 = arith.constant 0 : i32
    return %c0_i32, %c0_i32_0 : i32, i32
  }
  func.func @transform_4(%arg0: i32, %arg1: i32) -> (i32, i32) {
    %c0_i32 = arith.constant 0 : i32
    %c0_i32_0 = arith.constant 0 : i32
    %c0_i32_1 = arith.constant 0 : i32
    return %c0_i32, %c0_i32_0 : i32, i32
  }
  func.func @transform_5(%arg0: i32, %arg1: i32) -> (i32, i32) {
    %c0_i32 = arith.constant 0 : i32
    %c0_i32_0 = arith.constant 0 : i32
    %c0_i32_1 = arith.constant 0 : i32
    return %c0_i32, %c0_i32_0 : i32, i32
  }
  func.func @transform_6(%arg0: i32, %arg1: i32) -> (i32, i32) {
    %c0_i32 = arith.constant 0 : i32
    %c0_i32_0 = arith.constant 0 : i32
    %c0_i32_1 = arith.constant 0 : i32
    return %c0_i32, %c0_i32_0 : i32, i32
  }
  func.func @transform_7(%arg0: i32, %arg1: i32) -> (i32, i32) {
    %c0_i32 = arith.constant 0 : i32
    %c0_i32_0 = arith.constant 0 : i32
    %c0_i32_1 = arith.constant 0 : i32
    return %c0_i32, %c0_i32_0 : i32, i32
  }
  func.func @transform_8(%arg0: i32, %arg1: i32) -> (i32, i32) {
    %c0_i32 = arith.constant 0 : i32
    %c0_i32_0 = arith.constant 0 : i32
    %c0_i32_1 = arith.constant 0 : i32
    return %c0_i32, %c0_i32_0 : i32, i32
  }
  func.func @transform_9(%arg0: i32, %arg1: i32) -> (i32, i32) {
    %c0_i32 = arith.constant 0 : i32
    %c0_i32_0 = arith.constant 0 : i32
    %c0_i32_1 = arith.constant 0 : i32
    return %c0_i32, %c0_i32_0 : i32, i32
  }
  func.func @transform_10(%arg0: i32, %arg1: i32) -> (i32, i32) {
    %c0_i32 = arith.constant 0 : i32
    %c0_i32_0 = arith.constant 0 : i32
    %c0_i32_1 = arith.constant 0 : i32
    return %c0_i32, %c0_i32_0 : i32, i32
  }
  func.func @transform_11(%arg0: i32, %arg1: i32) -> (i32, i32) {
    %c0_i32 = arith.constant 0 : i32
    %c0_i32_0 = arith.constant 0 : i32
    %c0_i32_1 = arith.constant 0 : i32
    return %c0_i32, %c0_i32_0 : i32, i32
  }
  func.func @transform_12(%arg0: i32, %arg1: i32) -> (i32, i32, i32) {
    %c0_i32 = arith.constant 0 : i32
    %c0_i32_0 = arith.constant 0 : i32
    return %arg0, %c0_i32, %arg1 : i32, i32, i32
  }
}

</mosaic_0001>

<bundles_post_ra>
// kernel: causal_conv_pallas.1
= control target key start
LH: loop header
LB: loop body
LE: loop exit
PB: predicated region body
PF: predicated region fallthrough
CT: control target
= control target key end

     0   :  { %s1100_s23 = smov 0   ;;  %s1102_s24 = smov 0   ;;  %s1241_s0 = inlined_call_operand.vmem [shape: bf16[2,1,384], index: 0, kind: input, shape index: {}, may-alias: {0,1}]   ;;  %s1242_s1 = inlined_call_operand.vmem [shape: bf16[2,1,384], index: 1, kind: input, shape index: {}, may-alias: {0,1}]   ;;  %s1243_s2 = inlined_call_operand.vmem [shape: s32[1,128], index: 2, kind: input, shape index: {}]   ;;  %s1244_s3 = inlined_call_operand.vmem [shape: s32[12,1], index: 3, kind: input, shape index: {}]   ;;  %s1245_s4 = inlined_call_operand.vmem [shape: bf16[8,12], index: 4, kind: input, shape index: {}]   ;;  %s1246_s5 = inlined_call_operand.vmem [shape: f32[8,1], index: 5, kind: input, shape index: {}]   ;;  %s1247_s6 = inlined_call_operand.vmem [shape: f32[16,8], index: 6, kind: input, shape index: {}]   ;;  %s1248_s7 = inlined_call_operand.vmem [shape: f32[16,1], index: 7, kind: input, shape index: {}]   ;;  %s1249_s8 = inlined_call_operand.vmem [shape: f32[8,16], index: 8, kind: input, shape index: {}]   ;;  %s1250_s9 = inlined_call_operand.vmem [shape: f32[8,1], index: 9, kind: input, shape index: {}]   ;;  %s1251_s10 = inlined_call_operand.vmem [shape: f32[8,1], index: 10, kind: input, shape index: {}]   ;;  %s1252_s11 = inlined_call_operand.<no memory space> [shape: f32[1,1], index: 11, kind: input, shape index: {}]   ;;  %s1253_s12 = inlined_call_operand.vmem [shape: f32[2,1,256], index: 12, kind: output, shape index: {}]  }
   0x1   :  { %v17_v0 = vstv %s1252_s11  ;;  %s1104_s25 = smov 0   ;;  %s1106_s26 = smov 0  }
   0x2   :  { %18 = vst [vmem:[#allocation2] sm:$0x1] %v17_v0  ;;  %s1108_s27 = smov 0  }
   0x3 LB: > { %s33_s11 = sadd.s32 1, %s1010_s25  ;;  %s36_s28 = sadd.s32 1, %s1014_s26  ;;  %s1018_s27 = sphi %s1108_s27, %s24_s27   ;;  %s1014_s26 = sphi %s1106_s26, %s1263_s26   ;;  %s1010_s25 = sphi %s1104_s25, %s1262_s25   ;;  %s1006_s24 = sphi %s1102_s24, %s1261_s24   ;;  %s1002_s23 = sphi %s1100_s23, %s1260_s23  }
   0x4   : > { %p34_p0 = scmp.ge.s32.totalorder %s33_s11, 2  ;;  %p884_p1 = scmp.ge.s32.totalorder %s1018_s27, 1 }
   0x5   : > { %p400_p2 = scmp.lt.s32.totalorder %s1018_s27, 5 }
   0x6   : > { %s1265_s11 = smov (%p34_p0, %s33_s11), 0  ;;  %s1267_s28 = smov (!%p34_p0, %s36_s28), %s1014_s26 }
   0x7   : > { %p401_p3 = pnand %p884_p1, %p400_p2  ;;  %p38_p4 = scmp.ge.s32.totalorder %s1267_s28, 2 }
   0x8   : > { %p454_p5 = scmp.lt.s32.totalorder (!%p401_p3), %s1006_s24, 1  ;;  %p456_p6 = scmp.lt.s32.totalorder (!%p401_p3), %s1002_s23, 2 }
   0x9   : > { %s1269_s28 = smov (%p38_p4, %s1267_s28), 0  ;;  %404 = sbr.rel (%p401_p3) target bundleno = 620 (0x26c), region = 68 }
   0xa   : > { %s461_s29 = sadd.s32 (!%p401_p3), 1, %s1002_s23  ;;  %s1021_s22 = smov (!%p401_p3), 126  }
   0xb   : > { %p464_p7 = scmp.lt.s32.totalorder (!%p401_p3), %s461_s29, 2  ;;  %s1027_s16 = smov (!%p401_p3), 109  }
   0xc   : > { %s1028_s17 = smov (!%p401_p3), 110   ;;  %p472_p8 = scmp.lt.s32.totalorder (!%p401_p3), %s1002_s23, 1 }
   0xe   : > { %s1271_s24 = smov (!%p454_p5, %s1006_s24), 1  ;;  %s1273_s29 = smov (!%p464_p7, %s461_s29), 2  ;;  %v1020_v1 = vmov 0   ;;  %v631_v27 = vld [vmem:[%s1244_s3 + $0x8] sm:$0xf]  ;;  %v630_v28 = vld [vmem:[%s1244_s3] sm:$0xff] }
   0xf   : > { %s457_s30 = scalar_select %p456_p6, %s1002_s23, 2  ;;  %967 = vset.pattern.permute.xlu1 %v1020_v1  ;;  %966 = vset.pattern.permute.xlu0 %v1020_v1  ;;  %v650_v34 = vld [vmem:[%s1246_s5] sm:$0xff]  ;;  %vm490_vm0 = vcmask 1039360   ;;  %vm580_vm1 = vcmask 1040384   ;;  %vm581_vm2 = vsmask.f32 256 }
  0x10   : > { %s893_s13 = smul.u32 3, %s1271_s24  ;;  %978 = vset.pattern.permute.xlu2 %v1020_v1  ;;  %v682_v35 = vld [vmem:[%s1248_s7] sm:$0xff]  ;;  %vm501_vm3 = vcmask 1031168   ;;  %vm582_vm4 = vmand %vm580_vm1, %vm581_vm2  ;;  %vm509_vm5 = vcmask 1022976   ;;  %vm589_vm6 = vcmask 1041408   ;;  %vm526_vm9 = vcmask 916480  }
  0x11   : > { %v731_v36 = vld [vmem:[%s1250_s9] sm:$0xff]  ;;  %vm590_vm7 = vsmask.f32 1280  ;;  %vm598_vm10 = vcmask 1042432   ;;  %vm599_vm11 = vsmask.f32 2304 }
  0x12   : > { %s459_s14 = sadd.s32 %s893_s13, %s457_s30  ;;  %s467_s15 = sadd.s32 %s893_s13, %s1273_s29  ;;  %v765_v37 = vld [vmem:[#allocation2] sm:$0x1]  ;;  %vm1170_vm8 = vmand %vm589_vm6, %vm590_vm7  ;;  %vm518_vm12 = vcmask 1014784   ;;  %vm543_vm14 = vcmask 900096   ;;  %vm607_vm15 = vcmask 1043456   ;;  %vm625_vm7 = vcmask 1045504  }
  0x13   : > { %s460_s18 = scalar_lea.vmem %s1241_s0, %s459_s14  ;;  %s468_s21 = scalar_lea.vmem %s1242_s1, %s467_s15  ;;  %vm1178_vm13 = vmand %vm598_vm10, %vm599_vm11 }
  0x14   : > { %v1144_v2 = vld [vmem:[%s460_s18] sm:$0x1]  ;;  %s1022_s29 = smov 124   ;;  %s1023_s30 = smov 127  }
  0x15   : > { %v479_v3 = vld [vmem:[%s468_s21] sm:$0x1]  ;;  %v481_v4 = vshll.u32 %v1144_v2, 16  ;;  %v512_v7 = vrot.slane %v1144_v2, 6  ;;  %v495_v13 = vrot.slane %v1144_v2, 7  ;;  %s1024_s13 = smov 125  }
  0x16   : > { %v496_v5 = vrot.slane %v479_v3, 7  ;;  %v484_v6 = vshll.u32 %v479_v3, 16  ;;  %v513_v12 = vrot.slane %v479_v3, 6  ;;  %v529_v16 = vrot.slane %v1144_v2, 5  ;;  %s1025_s14 = smov 111   ;;  %s1026_s15 = smov 112  }
  0x17   : > { %v503_v9 = vrot.slane %v481_v4, 7  ;;  %514 = vrot.lane.b32.xlu2 %v512_v7, %s1022_s29  ;;  %v520_v14 = vrot.slane %v481_v4, 6  ;;  %v530_v17 = vrot.slane %v479_v3, 5  ;;  %v537_v19 = vrot.slane %v481_v4, 5  ;;  %s1275_s23 = smov (!%p472_p8, %s1002_s23), 1  ;;  %s885_s21 = sshll.u32 %s1271_s24, 1 }
  0x18   : > { %499 = vrot.lane.b32.xlu1 %v496_v5, %s1021_s22  ;;  %v946_v8 = vpack.i.bf16 %v484_v6, %v481_v4  ;;  %v504_v10 = vrot.slane %v484_v6, 7  ;;  %v521_v15 = vrot.slane %v484_v6, 6  ;;  %v538_v20 = vrot.slane %v484_v6, 5 }
  0x19   : > { %v546_v21 = vrot.slane %v1144_v2, 4  ;;  %v547_v22 = vrot.slane %v479_v3, 4  ;;  %v554_v24 = vrot.slane %v481_v4, 4  ;;  %v555_v25 = vrot.slane %v484_v6, 4 }
  0x1a   : > { %947 = vrot.lane.b32.xlu0 %v946_v8, %s1023_s30  ;;  %v951_v11 = vpack.i.bf16 %v504_v10, %v503_v9  ;;  %v956_v18 = vpack.i.bf16 %v521_v15, %v520_v14  ;;  %v961_v23 = vpack.i.bf16 %v538_v20, %v537_v19  ;;  %v571_v29 = vrot.slane %v481_v4, 3  ;;  %s1031_s30 = smov 95   ;;  %v979_v4 = vld [vmem:[%s1243_s2] ss:$0 sm:$0xff] }
  0x1b   : > { %v968_v26 = vpack.i.bf16 %v555_v25, %v554_v24  ;;  %v572_v30 = vrot.slane %v484_v6, 3  ;;  %v563_v31 = vrot.slane %v1144_v2, 3  ;;  %v564_v32 = vrot.slane %v479_v3, 3 }
  0x1d   : > { %v973_v33 = vpack.i.bf16 %v572_v30, %v571_v29 }
  0x1f   : > { %516 = vrot.lane.b32.xlu2 %v513_v12, %s1022_s29  ;;  %s1030_s29 = smov 96  }
  0x20   : > { %952 = vrot.lane.b32.xlu1 %v951_v11, %s1024_s13 }
  0x22   : > { %497 = vrot.lane.b32.xlu0 %v495_v13, %s1021_s22  ;;  %s1029_s22 = smov 108  }
  0x27   : > { %533 = vrot.lane.b32.xlu2 %v530_v17, %s1025_s14 }
  0x28   : > { %531 = vrot.lane.b32.xlu1 %v529_v16, %s1025_s14 }
  0x2a   : > { %957 = vrot.lane.b32.xlu0 %v956_v18, %s1026_s15 }
  0x2f   : > { %550 = vrot.lane.b32.xlu2 %v547_v22, %s1027_s16 }
  0x30   : > { %548 = vrot.lane.b32.xlu1 %v546_v21, %s1027_s16 }
  0x32   : > { %962 = vrot.lane.b32.xlu0 %v961_v23, %s1028_s17 }
  0x37   : > { %969 = vrot.lane.b32.xlu2 %v968_v26, %s1029_s22  ;;  %s475_s22 = sadd.s32 %s885_s21, %s1275_s23 }
  0x38   : > { %637 = vperm.xlu1 %967, %v631_v27   ;;  %s476_s13 = scalar_lea.vmem %s1253_s12, %s475_s22 }
  0x3a   : > { %634 = vperm.xlu0 %966, %v630_v28  }
  0x3f   : > { %567 = vrot.lane.b32.xlu2 %v564_v32, %s1030_s29 }
  0x40   : > { %565 = vrot.lane.b32.xlu1 %v563_v31, %s1030_s29 }
  0x42   : > { %974 = vrot.lane.b32.xlu0 %v973_v33, %s1031_s30 }
  0x48   : > { %653 = vperm.xlu1 %967, %v650_v34   ;;  %v649_v34 = vld [vmem:[%s1245_s4] sm:$0xf] }
  0x4a   : > { %686 = vperm.xlu0 %966, %v682_v35   ;;  %v683_v35 = vld [vmem:[%s1248_s7 + $0x8] sm:$0xff] }
  0x4b   : > { %691 = vperm.xlu2 %978, %v683_v35  }
  0x50   : > { %734 = vperm.xlu1 %967, %v731_v36   ;;  %v764_v36 = vld [vmem:[%s1251_s10] sm:$0xff] }
  0x52   : > { %780 = vperm.xlu0 %966, %v765_v37  }
  0x53   : > { %768 = vperm.xlu2 %978, %v764_v36  }
  0x71   : > { %v515_v38 = vpop.permute.xlu2 %514 }
  0x79   : > { %v517_v40 = vpop.permute.xlu2 %516 }
  0x7a   : > { %v519_v5 = vsel %vm518_vm12, %v515_v38, %v517_v40  ;;  %vm569_vm12 = vcmask 785408  }
  0x81   : > { %v534_v44 = vpop.permute.xlu2 %533 }
  0x89   : > { %v551_v49 = vpop.permute.xlu2 %550 }
  0x8a   : > { %v500_v39 = vpop.permute.xlu1 %499 }
  0x8c   : > { %v948_v41 = vpop.permute.xlu0 %947 }
  0x8d   : > { %v950_v47 = vunpack.i.h.bf16 %v948_v41  ;;  %v949_v48 = vunpack.i.l.bf16 %v948_v41  ;;  %v680_v41 = vld [vmem:[%s1247_s6] sm:$0xff] }
  0x8f   : > { %v491_v50 = vsel %vm490_vm0, %v949_v48, %v950_v47  ;;  %vm608_vm0 = vsmask.f32 3328 }
  0x90   : > { %v583_v55 = vsel %vm582_vm4, %v1144_v2, %v491_v50  ;;  %vm1189_vm2 = vmand %vm607_vm15, %vm608_vm0  ;;  %vm616_vm4 = vcmask 1044480  }
  0x91   : > { %v970_v3 = vpop.permute.xlu2 %969 }
  0x92   : > { %v953_v42 = vpop.permute.xlu1 %952  ;;  %v972_v16 = vunpack.i.h.bf16 %v970_v3  ;;  %v971_v17 = vunpack.i.l.bf16 %v970_v3 }
  0x93   : > { %v955_v51 = vunpack.i.h.bf16 %v953_v42  ;;  %v954_v52 = vunpack.i.l.bf16 %v953_v42 }
  0x94   : > { %v498_v43 = vpop.permute.xlu0 %497 }
  0x95   : > { %v502_v53 = vsel %vm501_vm3, %v498_v43, %v500_v39  ;;  %v510_v57 = vsel %vm509_vm5, %v954_v52, %v955_v51  ;;  %vm552_vm3 = vcmask 891904   ;;  %vm617_vm5 = vsmask.f32 4352 }
  0x96   : > { %v587_v59 = vsel %vm580_vm1, %v583_v55, %v502_v53  ;;  %vm535_vm1 = vcmask 908288   ;;  %vm618_vm0 = vmand %vm616_vm4, %vm617_vm5 }
  0x97   : > { %v592_v62 = vsel %vm1170_vm8, %v587_v59, %v510_v57  ;;  %vm626_vm8 = vsmask.f32 5376 }
  0x98   : > { %v596_v7 = vsel %vm589_vm6, %v592_v62, %v519_v5  ;;  %vm560_vm6 = vcmask 883712  }
  0x99   : > { %v568_v19 = vpop.permute.xlu2 %567  ;;  %v561_v22 = vsel %vm560_vm6, %v971_v17, %v972_v16  ;;  %vm694_vm6 = vcmask 64512  }
  0x9a   : > { %v532_v45 = vpop.permute.xlu1 %531 }
  0x9b   : > { %v536_v13 = vsel %vm535_vm1, %v532_v45, %v534_v44  ;;  %vm577_vm1 = vcmask 777216   ;;  %v681_v44 = vld [vmem:[%s1247_s6 + $0x8] sm:$0xff] }
  0x9c   : > { %v958_v46 = vpop.permute.xlu0 %957 }
  0x9d   : > { %v960_v60 = vunpack.i.h.bf16 %v958_v46  ;;  %v959_v61 = vunpack.i.l.bf16 %v958_v46 }
  0x9f   : > { %v527_v0 = vsel %vm526_vm9, %v959_v61, %v960_v60 }
  0xa0   : > { %v601_v8 = vsel %vm1178_vm13, %v596_v7, %v527_v0 }
  0xa1   : > { %v605_v15 = vsel %vm598_vm10, %v601_v8, %v536_v13  ;;  %vm627_vm10 = vmand %vm625_vm7, %vm626_vm8 }
  0xa2   : > { %v549_v54 = vpop.permute.xlu1 %548 }
  0xa3   : > { %v553_v20 = vsel %vm552_vm3, %v549_v54, %v551_v49  ;;  %v730_v54 = vld [vmem:[%s1249_s8] sm:$0xff] }
  0xa4   : > { %v963_v56 = vpop.permute.xlu0 %962 }
  0xa5   : > { %v965_v1 = vunpack.i.h.bf16 %v963_v56  ;;  %v964_v2 = vunpack.i.l.bf16 %v963_v56  ;;  %v692_v48 = vpop.permute.xlu2 %691 }
  0xa7   : > { %v544_v11 = vsel %vm543_vm14, %v964_v2, %v965_v1 }
  0xa8   : > { %v610_v18 = vsel %vm1189_vm2, %v605_v15, %v544_v11 }
  0xa9   : > { %v614_v23 = vsel %vm607_vm15, %v610_v18, %v553_v20  ;;  %vm656_vm15 = vcmask 97280  }
  0xaa   : > { %v638_v6 = vpop.permute.xlu1 %637  ;;  %v619_v28 = vsel %vm618_vm0, %v614_v23, %v561_v22 }
  0xab   : > { %v640_v12 = vadd.s32 %v979_v4, %v638_v6 }
  0xac   : > { %v635_v9 = vpop.permute.xlu0 %634 }
  0xad   : > { %v639_v14 = vadd.s32 %v979_v4, %v635_v9  ;;  %vm642_vm9 = vcmp.ge.s32.totalorder %v640_v12, 0  ;;  %vm644_vm11 = vcmp.lt.s32.totalorder %v640_v12, 16  ;;  %v769_v60 = vpop.permute.xlu2 %768 }
  0xae   : > { %vm646_vm2 = vmand %vm642_vm9, %vm644_vm11  ;;  %vm737_vm9 = vcmask 130048  }
  0xaf   : > { %vm641_vm13 = vcmp.ge.s32.totalorder %v639_v14, 0  ;;  %vm643_vm14 = vcmp.lt.s32.totalorder %v639_v14, 16 }
  0xb0   : > { %vm645_vm3 = vmand %vm641_vm13, %vm643_vm14 }
  0xb1   : > { %vm647_vm5 = vmpackc.low %vm646_vm2, %vm645_vm3 }
  0xb2   : > { %v566_v21 = vpop.permute.xlu1 %565 }
  0xb3   : > { %v570_v24 = vsel %vm569_vm12, %v566_v21, %v568_v19 }
  0xb4   : > { %v975_v25 = vpop.permute.xlu0 %974  ;;  %v623_v30 = vsel %vm616_vm4, %v619_v28, %v570_v24 }
  0xb5   : > { %v977_v26 = vunpack.i.h.bf16 %v975_v25  ;;  %v976_v27 = vunpack.i.l.bf16 %v975_v25 }
  0xb7   : > { %v578_v29 = vsel %vm577_vm1, %v976_v27, %v977_v26 }
  0xb8   : > { %v628_v31 = vsel %vm627_vm10, %v623_v30, %v578_v29 }
  0xb9   : > { %v648_v32 = vsel %vm647_vm5, %v628_v31, 0 }
  0xba   : > { %v662_v33 = vsel %vm625_vm7, %v648_v32, 0  ;;  %v654_v37 = vpop.permute.xlu1 %653 }
  0xbb   : > { %671 = vmatpush.bf16.msra.mxu0 %v662_v33 }
  0xbc   : > { %v687_v46 = vpop.permute.xlu0 %686 }
  0xbe   : > { %886 = vmatmul.msk.bf16.vlgmr.msra.gmra.mxu0 %vm656_vm15, %v649_v34 }
  0xc2   : > { %v735_v56 = vpop.permute.xlu1 %734 }
  0xc4   : > { %v781_v3 = vpop.permute.xlu0 %780 }
  0xc5   : > { %v783_v5 = vperm.slane %v781_v3, 0 }
 0x13b   : > { %v673_v38 = vpop.f32.mrf.mxu0 }
 0x13c   : > { %v674_v39 = vadd.f32 %v673_v38, %v654_v37 }
 0x13e   : > { %vm677_vm4 = vcmp.ge.f32.partialorder %v674_v39, 0.0  ;;  %v678_v40 = vmul.f32 0.01, %v674_v39 }
 0x140   : > { %v679_v42 = vsel %vm677_vm4, %v674_v39, %v678_v40 }
 0x141   : > { %716 = vmatpush.msra.mxu1 %v679_v42 }
 0x142   : > { %887 = vmatmul.msk.f32.vlgmr.msra.gmra.mxu1 %vm694_vm6, %v680_v41 }
 0x143   : > { %v675_v43 = vpop.f32.mrf.mxu0 }
 0x14a   : > { %888 = vmatmul.msk.f32.gmra.mxu1 %vm694_vm6, %v681_v44 }
 0x1bf   : > { %v718_v45 = vpop.f32.mrf.mxu1 }
 0x1c0   : > { %v719_v47 = vadd.f32 %v718_v45, %v687_v46 }
 0x1c2   : > { %v726_v52 = vmul.f32 0.01, %v719_v47  ;;  %vm724_vm8 = vcmp.ge.f32.partialorder %v719_v47, 0.0 }
 0x1c4   : > { %v728_v55 = vsel %vm724_vm8, %v719_v47, %v726_v52 }
 0x1c7   : > { %v721_v49 = vpop.f32.mrf.mxu1 }
 0x1c8   : > { %v722_v50 = vadd.f32 %v721_v49, %v692_v48 }
 0x1ca   : > { %vm725_vm7 = vcmp.ge.f32.partialorder %v722_v50, 0.0  ;;  %v727_v51 = vmul.f32 0.01, %v722_v50 }
 0x1cc   : > { %v729_v53 = vsel %vm725_vm7, %v722_v50, %v727_v51 }
 0x1cd   : > { %755 = vmatpush.msra.mxu2 %v729_v53 }
 0x1cf   : > { %756 = vmatpush.msra.mxu2 %v728_v55 }
 0x1d0   : > { %889 = vmatmul.msk.f32.vlgmr.msra.gmra.mxu2 %vm737_vm9, %v730_v54 }
 0x253   : > { %v758_v57 = vpop.f32.mrf.mxu2 }
 0x254   : > { %v759_v58 = vadd.f32 %v758_v57, %v735_v56 }
 0x256   : > { %vm761_vm11 = vcmp.ge.f32.partialorder %v759_v58, 0.0  ;;  %v762_v59 = vmul.f32 0.01, %v759_v58 }
 0x258   : > { %v763_v61 = vsel %vm761_vm11, %v759_v58, %v762_v59 }
 0x259   : > { %v771_v62 = vmul.f32 %v769_v60, %v763_v61 }
 0x25b   : > { %v772_v63 = vrot.slane %v771_v62, 4 }
 0x25d   : > { %v773_v0 = vadd.f32 %v772_v63, %v771_v62 }
 0x25f   : > { %v774_v1 = vrot.slane %v773_v0, 2 }
 0x261   : > { %v775_v2 = vadd.f32 %v774_v1, %v773_v0 }
 0x263   : > { %v776_v4 = vrot.slane %v775_v2, 1 }
 0x265   : > { %v777_v6 = vadd.f32 %v776_v4, %v775_v2 }
 0x267   : > { %v784_v7 = vadd.f32 %v783_v5, %v777_v6 }
 0x269   : > { %v890_v8 = vclamps-f32 %v784_v7, 1.0 }
 0x26b   : > { %787 = vst [vmem:[%s476_s13] sm:$0x1] %v890_v8 }
 0x26c PF: > { %s24_s27 = sadd.s32 1, %s1018_s27   ;;  %s1260_s23 = smov %s1010_s25 }
 0x26d   : > { %p21_p9 = scmp.ge.s32.totalorder %s24_s27, 6   ;;  %s1261_s24 = smov %s1014_s26 }
 0x26e   : > { %s1262_s25 = smov %s1265_s11  ;;  %s1263_s26 = smov %s1269_s28 }
 0x26f   :  { %23 = sbr.rel (!%p21_p9) target bundleno = 3 (0x3), region = 101 }

</bundles_post_ra>
